<compile_context>
chip_gen: v6e
topology: v6e:2x2x1
jax: 0.10.0
libtpu: 0.0.40
codegen_flags: <defaults>
</compile_context>

<pallas_src>
import jax
import jax.numpy as jnp
from jax.experimental import pallas as pl
from jax.experimental.pallas import tpu as pltpu


def _simnet_pair_kernel(a_ref, b_ref, q_ref, w1x_ref, w1q_ref, b1_ref,
                        w2_ref, b2_ref, out_ref):
    # a_ref, b_ref, q_ref : (TB, D) bf16  VMEM   (blocked over batch)
    # w1x_ref, w1q_ref    : (D, H)  bf16  VMEM   (resident across grid)
    # b1_ref              : (1, H)  f32   VMEM   (resident)
    # w2_ref              : (1, H)  f32   VMEM   (resident, lane-dense row)
    # b2_ref              : (1, 1)  f32   SMEM   (scalar)
    # out_ref             : (2, TB) f32   VMEM   (row 0 = score_A, 1 = score_B)
    b2 = b2_ref[0, 0]
    w2_row = w2_ref[...]                                            # (1, H) f32

    # Shared query embedding: computed ONCE per block, reused for A and B.
    hq = (jnp.dot(q_ref[...], w1q_ref[...],
                  preferred_element_type=jnp.float32)
          + b1_ref[...])                                            # (TB, H) f32

    # Two matmuls against the resident W1x (no concat/reshape copies).
    ha = jnp.maximum(
        jnp.dot(a_ref[...], w1x_ref[...],
                preferred_element_type=jnp.float32) + hq, 0.0)      # (TB, H)
    hb = jnp.maximum(
        jnp.dot(b_ref[...], w1x_ref[...],
                preferred_element_type=jnp.float32) + hq, 0.0)      # (TB, H)

    # Second layer (output width 1): VPU multiply + XLU lane reduction.
    score_a = jnp.sum(ha * w2_row, axis=-1) + b2                    # (TB,)
    score_b = jnp.sum(hb * w2_row, axis=-1) + b2                    # (TB,)

    out_ref[0, :] = score_a.astype(out_ref.dtype)
    out_ref[1, :] = score_b.astype(out_ref.dtype)


def simnet_trainer_forward(db_a, db_b, query, params, block_batch=128):
    """Returns (sim_score_A, sim_score_B), each of shape (batch, 1)."""
    w1x, w1q, b1, w2, b2 = params
    B, D = query.shape
    H = w1x.shape[1]

    # Lane-dense batch tile when possible; otherwise whole batch in one block.
    # TODO(synk): no masking for a ragged final batch tile (B not a multiple
    # of block_batch falls back to a single whole-batch block).
    tb = block_batch if (B % block_batch == 0) else B
    grid = (B // tb,)

    # bf16 for MXU operands (halves DMA bytes, native MXU rate); accumulation
    # and all post-matmul elementwise stay f32 inside the kernel.
    db_a_bf = db_a.astype(jnp.bfloat16)
    db_b_bf = db_b.astype(jnp.bfloat16)
    query_bf = query.astype(jnp.bfloat16)
    w1x_bf = w1x.astype(jnp.bfloat16)
    w1q_bf = w1q.astype(jnp.bfloat16)

    out = pl.pallas_call(
        _simnet_pair_kernel,
        out_shape=jax.ShapeDtypeStruct((2, B), jnp.float32),
        grid=grid,
        in_specs=[
            pl.BlockSpec((tb, D), lambda i: (i, 0)),   # db_a   (blocked)
            pl.BlockSpec((tb, D), lambda i: (i, 0)),   # db_b   (blocked)
            pl.BlockSpec((tb, D), lambda i: (i, 0)),   # query  (blocked, shared)
            pl.BlockSpec((D, H), lambda i: (0, 0)),    # W1x    (resident)
            pl.BlockSpec((D, H), lambda i: (0, 0)),    # W1q    (resident)
            pl.BlockSpec((1, H), lambda i: (0, 0)),    # b1     (resident)
            pl.BlockSpec((1, H), lambda i: (0, 0)),    # w2     (resident)
            pl.BlockSpec(memory_space=pltpu.MemorySpace.SMEM),   # b2 scalar
        ],
        out_specs=pl.BlockSpec((2, tb), lambda i: (0, i)),
        compiler_params=pltpu.CompilerParams(
            # Shard the batch grid across v7x's 2 TensorCores.
            dimension_semantics=("parallel",),
            # Per-block working set: 3 x (tb, D) bf16 double-buffered (~192 KiB
            # at tb=D=128) + resident weights (~64 KiB bf16) + output.  8 MiB
            # leaves ample headroom on every generation (v5e scoped default
            # is 16 MiB, v7x physical is 64 MiB).
            vmem_limit_bytes=8 * 1024 * 1024,
        ),
    )(db_a_bf, db_b_bf, query_bf, w1x_bf, w1q_bf, b1, w2, b2)

    # Present per-example scalar scores as (B, 1) like the module contract.
    return out[0].reshape(B, 1), out[1].reshape(B, 1)


def _reference_forward(db_a, db_b, query, params):
    w1x, w1q, b1, w2, b2 = params

    def simnet(x, q):
        h = jnp.maximum(x @ w1x + q @ w1q + b1, 0.0)
        return h @ w2.T + b2      # (B, 1)

    return simnet(db_a, query), simnet(db_b, query)


def _init_params(key, D, H):
    k1, k2, k3, k4, k5 = jax.random.split(key, 5)
    w1x = jax.random.normal(k1, (D, H), jnp.float32) * 0.05
    w1q = jax.random.normal(k2, (D, H), jnp.float32) * 0.05
    b1 = jax.random.normal(k3, (1, H), jnp.float32) * 0.01
    w2 = jax.random.normal(k4, (1, H), jnp.float32) * 0.05   # row vector (lane-dense)
    b2 = jax.random.normal(k5, (1, 1), jnp.float32) * 0.01
    return (w1x, w1q, b1, w2, b2)


if __name__ == "__main__":
    # batch, feature dim, hidden dim: batch is 2 lane-dense (TB=128) tiles so
    # the grid actually pipelines; D = H = 128 are MXU/tile aligned.
    B, D, H = 256, 128, 128

    key = jax.random.PRNGKey(0)
    kp, ka, kb, kq = jax.random.split(key, 4)
    params = _init_params(kp, D, H)

    db_a = jax.random.normal(ka, (B, D), jnp.float32)
    db_b = jax.random.normal(kb, (B, D), jnp.float32)
    query = jax.random.normal(kq, (B, D), jnp.float32)

    score_a, score_b = simnet_trainer_forward(db_a, db_b, query, params)
    score_a = jax.block_until_ready(score_a)
    score_b = jax.block_until_ready(score_b)

    # Full-f32 reference; kernel uses bf16 MXU inputs, hence the tolerance.
    ref_a, ref_b = _reference_forward(db_a, db_b, query, params)
    assert score_a.shape == (B, 1) and score_b.shape == (B, 1)
    assert jnp.allclose(score_a, ref_a, atol=2e-2, rtol=2e-2)
    assert jnp.allclose(score_b, ref_b, atol=2e-2, rtol=2e-2)

    print("KERNEL_OK")
</pallas_src>

<mosaic_0001>
module attributes {stable_mosaic.version = 11 : i64} {
  func.func @_simnet_pair_kernel(%arg0: i32, %arg1: memref<128x128xbf16, #tpu.memory_space<vmem>>, %arg2: memref<128x128xbf16, #tpu.memory_space<vmem>>, %arg3: memref<128x128xbf16, #tpu.memory_space<vmem>>, %arg4: memref<128x128xbf16, #tpu.memory_space<vmem>>, %arg5: memref<128x128xbf16, #tpu.memory_space<vmem>>, %arg6: memref<1x128xf32, #tpu.memory_space<vmem>>, %arg7: memref<1x128xf32, #tpu.memory_space<vmem>>, %arg8: memref<1x1xf32, #tpu.memory_space<smem>>, %arg9: memref<2x128xf32, #tpu.memory_space<vmem>>) attributes {dimension_semantics = [#tpu.dimension_semantics<parallel>], iteration_bounds = array<i64: 2>, scalar_prefetch = 0 : i64, scratch_operands = 0 : i64, tpu.core_type = #tpu.core_type<tc>, window_params = [{transform_indices = @transform_0, window_bounds = array<i64: 128, 128>}, {transform_indices = @transform_1, window_bounds = array<i64: 128, 128>}, {transform_indices = @transform_2, window_bounds = array<i64: 128, 128>}, {pipeline_mode = #tpu.pipeline_mode<synchronous>, transform_indices = @transform_3, window_bounds = array<i64: 128, 128>}, {pipeline_mode = #tpu.pipeline_mode<synchronous>, transform_indices = @transform_4, window_bounds = array<i64: 128, 128>}, {pipeline_mode = #tpu.pipeline_mode<synchronous>, transform_indices = @transform_5, window_bounds = array<i64: 1, 128>}, {pipeline_mode = #tpu.pipeline_mode<synchronous>, transform_indices = @transform_6, window_bounds = array<i64: 1, 128>}, {transform_indices = @transform_7, window_bounds = array<i64: 1, 1>}, {transform_indices = @transform_8, window_bounds = array<i64: 2, 128>}]} {
    %c0 = arith.constant 0 : index
    %c0_0 = arith.constant 0 : index
    %0 = memref.load %arg8[%c0, %c0_0] : memref<1x1xf32, #tpu.memory_space<smem>>
    %c0_1 = arith.constant 0 : index
    %c0_2 = arith.constant 0 : index
    %1 = vector.load %arg7[%c0_1, %c0_2] : memref<1x128xf32, #tpu.memory_space<vmem>>, vector<1x128xf32>
    %c0_3 = arith.constant 0 : index
    %c0_4 = arith.constant 0 : index
    %2 = vector.load %arg3[%c0_3, %c0_4] : memref<128x128xbf16, #tpu.memory_space<vmem>>, vector<128x128xbf16>
    %c0_5 = arith.constant 0 : index
    %c0_6 = arith.constant 0 : index
    %3 = vector.load %arg5[%c0_5, %c0_6] : memref<128x128xbf16, #tpu.memory_space<vmem>>, vector<128x128xbf16>
    %cst = arith.constant dense<0.000000e+00> : vector<128x128xf32>
    %4 = tpu.matmul %2, %3, %cst {dimension_numbers = #tpu.dot_dimension_numbers<[1], [0], [0], [1], [0, 0, 1, 1], [], []>} : vector<128x128xbf16>, vector<128x128xbf16>, vector<128x128xf32> -> vector<128x128xf32>
    %c0_7 = arith.constant 0 : index
    %c0_8 = arith.constant 0 : index
    %5 = vector.load %arg6[%c0_7, %c0_8] : memref<1x128xf32, #tpu.memory_space<vmem>>, vector<1x128xf32>
    %6 = vector.broadcast %5 : vector<1x128xf32> to vector<128x128xf32>
    %7 = arith.addf %4, %6 : vector<128x128xf32>
    %c0_9 = arith.constant 0 : index
    %c0_10 = arith.constant 0 : index
    %8 = vector.load %arg1[%c0_9, %c0_10] : memref<128x128xbf16, #tpu.memory_space<vmem>>, vector<128x128xbf16>
    %c0_11 = arith.constant 0 : index
    %c0_12 = arith.constant 0 : index
    %9 = vector.load %arg4[%c0_11, %c0_12] : memref<128x128xbf16, #tpu.memory_space<vmem>>, vector<128x128xbf16>
    %cst_13 = arith.constant dense<0.000000e+00> : vector<128x128xf32>
    %10 = tpu.matmul %8, %9, %cst_13 {dimension_numbers = #tpu.dot_dimension_numbers<[1], [0], [0], [1], [0, 0, 1, 1], [], []>} : vector<128x128xbf16>, vector<128x128xbf16>, vector<128x128xf32> -> vector<128x128xf32>
    %11 = arith.addf %10, %7 : vector<128x128xf32>
    %cst_14 = arith.constant 0.000000e+00 : f32
    %12 = vector.broadcast %cst_14 : f32 to vector<128x128xf32>
    %13 = arith.maximumf %11, %12 : vector<128x128xf32>
    %c0_15 = arith.constant 0 : index
    %c0_16 = arith.constant 0 : index
    %14 = vector.load %arg2[%c0_15, %c0_16] : memref<128x128xbf16, #tpu.memory_space<vmem>>, vector<128x128xbf16>
    %c0_17 = arith.constant 0 : index
    %c0_18 = arith.constant 0 : index
    %15 = vector.load %arg4[%c0_17, %c0_18] : memref<128x128xbf16, #tpu.memory_space<vmem>>, vector<128x128xbf16>
    %cst_19 = arith.constant dense<0.000000e+00> : vector<128x128xf32>
    %16 = tpu.matmul %14, %15, %cst_19 {dimension_numbers = #tpu.dot_dimension_numbers<[1], [0], [0], [1], [0, 0, 1, 1], [], []>} : vector<128x128xbf16>, vector<128x128xbf16>, vector<128x128xf32> -> vector<128x128xf32>
    %17 = arith.addf %16, %7 : vector<128x128xf32>
    %cst_20 = arith.constant 0.000000e+00 : f32
    %18 = vector.broadcast %cst_20 : f32 to vector<128x128xf32>
    %19 = arith.maximumf %17, %18 : vector<128x128xf32>
    %20 = vector.broadcast %1 : vector<1x128xf32> to vector<128x128xf32>
    %21 = arith.mulf %13, %20 : vector<128x128xf32>
    %cst_21 = arith.constant dense<0.000000e+00> : vector<128xf32>
    %22 = vector.multi_reduction <add>, %21, %cst_21 [1] : vector<128x128xf32> to vector<128xf32>
    %23 = vector.broadcast %0 : f32 to vector<128xf32>
    %24 = arith.addf %22, %23 : vector<128xf32>
    %25 = vector.broadcast %1 : vector<1x128xf32> to vector<128x128xf32>
    %26 = arith.mulf %19, %25 : vector<128x128xf32>
    %cst_22 = arith.constant dense<0.000000e+00> : vector<128xf32>
    %27 = vector.multi_reduction <add>, %26, %cst_22 [1] : vector<128x128xf32> to vector<128xf32>
    %28 = vector.broadcast %0 : f32 to vector<128xf32>
    %29 = arith.addf %27, %28 : vector<128xf32>
    %c0_23 = arith.constant 0 : index
    %c0_24 = arith.constant 0 : index
    %30 = vector.load %arg9[%c0_23, %c0_24] : memref<2x128xf32, #tpu.memory_space<vmem>>, vector<1x128xf32>
    %31 = vector.shape_cast %30 : vector<1x128xf32> to vector<128xf32>
    %32 = vector.shape_cast %24 : vector<128xf32> to vector<1x128xf32>
    tpu.vector_store %arg9[%c0_23, %c0_24], %32 {strides = array<i32>} : memref<2x128xf32, #tpu.memory_space<vmem>>, vector<1x128xf32>,
    %c1 = arith.constant 1 : index
    %c0_25 = arith.constant 0 : index
    %33 = vector.load %arg9[%c1, %c0_25] : memref<2x128xf32, #tpu.memory_space<vmem>>, vector<1x128xf32>
    %34 = vector.shape_cast %33 : vector<1x128xf32> to vector<128xf32>
    %35 = vector.shape_cast %29 : vector<128xf32> to vector<1x128xf32>
    tpu.vector_store %arg9[%c1, %c0_25], %35 {strides = array<i32>} : memref<2x128xf32, #tpu.memory_space<vmem>>, vector<1x128xf32>,
    return
  }
  func.func @transform_0(%arg0: i32) -> (i32, i32) {
    %c0_i32 = arith.constant 0 : i32
    %c0_i32_0 = arith.constant 0 : i32
    return %arg0, %c0_i32 : i32, i32
  }
  func.func @transform_1(%arg0: i32) -> (i32, i32) {
    %c0_i32 = arith.constant 0 : i32
    %c0_i32_0 = arith.constant 0 : i32
    return %arg0, %c0_i32 : i32, i32
  }
  func.func @transform_2(%arg0: i32) -> (i32, i32) {
    %c0_i32 = arith.constant 0 : i32
    %c0_i32_0 = arith.constant 0 : i32
    return %arg0, %c0_i32 : i32, i32
  }
  func.func @transform_3(%arg0: i32) -> (i32, i32) {
    %c0_i32 = arith.constant 0 : i32
    %c0_i32_0 = arith.constant 0 : i32
    %c0_i32_1 = arith.constant 0 : i32
    return %c0_i32, %c0_i32_0 : i32, i32
  }
  func.func @transform_4(%arg0: i32) -> (i32, i32) {
    %c0_i32 = arith.constant 0 : i32
    %c0_i32_0 = arith.constant 0 : i32
    %c0_i32_1 = arith.constant 0 : i32
    return %c0_i32, %c0_i32_0 : i32, i32
  }
  func.func @transform_5(%arg0: i32) -> (i32, i32) {
    %c0_i32 = arith.constant 0 : i32
    %c0_i32_0 = arith.constant 0 : i32
    %c0_i32_1 = arith.constant 0 : i32
    return %c0_i32, %c0_i32_0 : i32, i32
  }
  func.func @transform_6(%arg0: i32) -> (i32, i32) {
    %c0_i32 = arith.constant 0 : i32
    %c0_i32_0 = arith.constant 0 : i32
    %c0_i32_1 = arith.constant 0 : i32
    return %c0_i32, %c0_i32_0 : i32, i32
  }
  func.func @transform_7(%arg0: i32) -> (i32, i32) {
    %c0_i32 = arith.constant 0 : i32
    %c0_i32_0 = arith.constant 0 : i32
    %c0_i32_1 = arith.constant 0 : i32
    return %c0_i32, %c0_i32_0 : i32, i32
  }
  func.func @transform_8(%arg0: i32) -> (i32, i32) {
    %c0_i32 = arith.constant 0 : i32
    %c0_i32_0 = arith.constant 0 : i32
    return %c0_i32, %arg0 : i32, i32
  }
}

</mosaic_0001>

<bundles_post_ra>
// kernel: tpu_custom_call.1
= control target key start
LH: loop header
LB: loop body
LE: loop exit
PB: predicated region body
PF: predicated region fallthrough
CT: control target
= control target key end

     0   :  { %s2853_s0 = inlined_call_operand.hbm [shape: bf16[256,128], index: 0, kind: input, shape index: {}]   ;;  %s2854_s1 = inlined_call_operand.hbm [shape: bf16[256,128], index: 1, kind: input, shape index: {}]   ;;  %s2855_s2 = inlined_call_operand.hbm [shape: bf16[256,128], index: 2, kind: input, shape index: {}]   ;;  %s2856_s3 = inlined_call_operand.hbm [shape: bf16[128,128], index: 3, kind: input, shape index: {}]   ;;  %s2857_s4 = inlined_call_operand.hbm [shape: bf16[128,128], index: 4, kind: input, shape index: {}]   ;;  %s2858_s5 = inlined_call_operand.vmem [shape: f32[1,128], index: 5, kind: input, shape index: {}]   ;;  %s2859_s6 = inlined_call_operand.vmem [shape: f32[1,128], index: 6, kind: input, shape index: {}]   ;;  %s2860_s7 = inlined_call_operand.<no memory space> [shape: f32[1,1], index: 7, kind: input, shape index: {}]   ;;  %s2861_s8 = inlined_call_operand.hbm [shape: f32[2,256], index: 8, kind: output, shape index: {}]  }
   0x1   :  { %2877 = sst [smem:[#allocation20_spill]] %s2854_s1 }
   0x2   :  { %2878 = sst [smem:[#allocation21_spill]] %s2856_s3 }
   0x3   :  { %2879 = sst [smem:[#allocation22_spill]] %s2857_s4 }
   0x4   :  { %13 = sst [smem:[#allocation2]] %s2860_s7 }
   0x5   :  { %14 = vsyncpa [#allocation4], 0 }
   0x6   :  { %16 = vsyncpa [#allocation4 + $0x1], 0 }
   0x7   :  { %17 = vsyncpa [#allocation7], 0 }
   0x8   :  { %19 = vsyncpa [#allocation7 + $0x1], 0 }
   0x9   :  { %20 = vsyncpa [#allocation10], 0 }
   0xa   :  { %21 = vsyncpa [#allocation5], 0 }
   0xb   :  { %23 = vsyncpa [#allocation5 + $0x1], 0  ;;  %s2209_s29 = smov 0   ;;  %s2211_s30 = smov 0  }
   0xc   :  { %s2213_s9 = smov 0   ;;  %s2215_s10 = smov 0  }
   0xd LB: > { %2880 = sst [smem:[#allocation17_spill]] %s2151_s10  ;;  %s2230_s7 = sadd.s32 4294967295, %s2151_s10   ;;  %s2151_s10 = sphi %s2215_s10, %s2907_s10   ;;  %s2147_s9 = sphi %s2213_s9, %s2911_s9   ;;  %s2143_s30 = sphi %s2211_s30, %s2910_s30   ;;  %s2139_s29 = sphi %s2209_s29, %s2909_s29  }
   0xe   : > { %s1594_s11 = sadd.s32 4294967294, %s2151_s10   ;;  %s2234_s12 = sadd.s32 1, %s2151_s10  }
   0xf   : > { %2881 = sst [smem:[#allocation18_spill]] %s2234_s12  ;;  %s36_s13 = sadd.s32 1, %s2147_s9 }
  0x10   : > { %s33_s14 = ssub.s32 %s2151_s10, %s2234_s12  ;;  %p43_p0 = scmp.ne.s32.totalorder %s2147_s9, %s2143_s30 }
  0x11   : > { %p34_p1 = scmp.eq.s32.totalorder %s33_s14, 0  ;;  %p44_p2 = scmp.eq.s32.totalorder %s2151_s10, 0 }
  0x12   : > { %p49_p3 = scmp.ne.s32.totalorder %s2143_s30, %s2139_s29  ;;  %p2862_p4 = scmp.eq.s32.totalorder %s2230_s7, 0 }
  0x13   : > { %s2246_s15 = scalar_select %p34_p1, %s2147_s9, %s36_s13  }
  0x14   : > { %p2248_p5 = por %p44_p2, %p43_p0  ;;  %p2254_p6 = por %p2862_p4, %p49_p3 }
  0x15   : > { %2882 = sst [smem:[#allocation19_spill]] %s2246_s15  ;;  %p230_p7 = scmp.eq.s32.totalorder %s2230_s7, 1 }
  0x16   : > { %s2884_s17 = scalar_select %p2254_p6, 1, 0 }
  0x17   : > { %p236_p8 = scmp.eq.s32.totalorder %s1594_s11, 1  ;;  %p1595_p9 = scmp.ge.s32.totalorder %s2151_s10, 1 }
  0x18   : > { %p243_p10 = scmp.lt.s32.totalorder %s2151_s10, 3  ;;  %p2261_p11 = por %p230_p7, %p43_p0 }
  0x19   : > { %p2265_p12 = por %p236_p8, %p49_p3  ;;  %s2153_s21 = smov [#allocation9]  }
  0x1a   : > { %s2885_s18 = scalar_select %p2261_p11, 1, 0 }
  0x1b   : > { %s2886_s19 = scalar_select %p2265_p12, 1, 0 }
  0x1c   : > { %p2269_p13 = pnand %p1595_p9, %p243_p10  ;;  %s255_s22 = sshll.u32 %s2153_s21, 4  ;;  %s256_s22 = int_to_ptr.vmem [resolvable:$true] %s255_s22 }
  0x1d   : > { %p1863_p3 = scmp.lt.s32.totalorder %s2151_s10, 2  ;;  %s2864_s24 = sand.u32 1, %s2147_s9  }
  0x1e   : > { %s2887_s20 = scalar_select %p2269_p13, 1, 0 }
  0x1f   : > { %p1840_p1 = pneg %p2269_p13  ;;  %s2286_s25 = sshll.u32 %s2864_s24, 6 }
  0x20   : > { %s1954_s26 = scalar_lea.vmem %s256_s22, 1024 }
  0x21   : > { %p2277_p2 = pnand %p1840_p1, %p2862_p4  ;;  %p1955_p8 = scmp.ne.s32.totalorder %s256_s22, %s1954_s26 }
  0x22   : > { %p1962_p1 = scmp.lt.s32.totalorder %s256_s22, %s256_s22  ;;  %p1963_p4 = scmp.lt.s32.totalorder %s1954_s26, %s1954_s26 }
  0x23   : > { %s2888_s23 = scalar_select %p2277_p2, 1, 0 }
  0x24   : > { %p2872_p7 = pneg %p2277_p2  ;;  %p1964_p12 = por %p1963_p4, %p1962_p1 }
  0x26   : > { %p1957_p9 = pnand %p1955_p8, %p2872_p7 }
  0x28   : > { %p1958_p10 = pneg %p1957_p9 }
  0x2a   : > { %p1965_p11 = pnand %p1964_p12, %p1958_p10 }
  0x2c   : > { %1968 = shalt.err (!%p1965_p11)
}
  0x2d   : > { %s2867_s27 = smov 64   ;;  %s2869_s28 = smov 4  }
  0x2e   : > { %s2889_s3 = sld [smem:[#allocation21_spill]]  ;;  %s2302_s14 = sshll.u32 %s2151_s10, 10 }
  0x2f   : > { %p2308_p4 = pnand %p1863_p3, %p2248_p5  ;;  %s312_s26 = sand.u32 1, %s2151_s10  }
  0x30   : > { %s2891_s1 = sld [smem:[#allocation20_spill]]  ;;  %s2322_s16 = scalar_lea.sflag [#allocation7], %s312_s26 }
  0x31   : > { %p2328_p11 = pneg %p2308_p4 }
  0x34   : > { %1843 = dma.hbm_to_vmem [thread:$0]  (!%p2277_p2), %s2889_s3, 1024, %s256_s22, [#allocation10], %s2867_s27, %s2867_s27, %s2869_s28  }
  0x35   : > { %s316_s22 = scalar_lea.vmem [#allocation6], %s2286_s25 }
  0x36   : > { %s2317_s12 = scalar_lea.hbm %s2891_s1, %s2302_s14  ;;  %s323_s11 = sshll.u32 %s316_s22, 4  ;;  %s2320_s11 = int_to_ptr.vmem [resolvable:$true] %s323_s11 }
  0x37   : > { %s1969_s13 = scalar_lea.hbm %s2317_s12, 1024  ;;  %s1974_s28 = scalar_lea.hbm %s2891_s1, 2048 }
  0x38   : > { %p1970_p5 = scmp.ne.s32.totalorder %s2317_s12, %s1969_s13  ;;  %p1975_p8 = scmp.lt.s32.totalorder %s2317_s12, %s2891_s1 }
  0x39   : > { %p1976_p9 = scmp.lt.s32.totalorder %s1974_s28, %s1969_s13 }
  0x3a   : > { %p1972_p12 = pnand %p2328_p11, %p1970_p5 }
  0x3b   : > { %p1977_p10 = por %p1976_p9, %p1975_p8 }
  0x3c   : > { %p1973_p3 = pneg %p1972_p12 }
  0x3e   : > { %p1978_p1 = pnand %p1977_p10, %p1973_p3 }
  0x40   : > { %1981 = shalt.err (!%p1978_p1)
}
  0x41   : > { %s1982_s26 = scalar_lea.vmem %s2320_s11, 1024  ;;  %s2156_s10 = smov [#allocation6]  }
  0x42   : > { %p1983_p0 = scmp.ne.s32.totalorder %s2320_s11, %s1982_s26  ;;  %s1987_s15 = sshll.u32 %s2156_s10, 4  ;;  %s1988_s15 = int_to_ptr.vmem [resolvable:$false] %s1987_s15 }
  0x43   : > { %s1989_s24 = scalar_lea.vmem %s1988_s15, 2048  ;;  %p1990_p7 = scmp.lt.s32.totalorder %s2320_s11, %s1988_s15 }
  0x44   : > { %p1985_p5 = pnand %p1983_p0, %p2328_p11  ;;  %p1991_p6 = scmp.lt.s32.totalorder %s1989_s24, %s1982_s26 }
  0x46   : > { %p1986_p12 = pneg %p1985_p5  ;;  %p1992_p13 = por %p1991_p6, %p1990_p7 }
  0x48   : > { %p1993_p2 = pnand %p1992_p13, %p1986_p12 }
  0x4a   : > { %1996 = shalt.err (!%p1993_p2)
}
  0x4b   : > { %s2893_s3 = smov 4   ;;  %s2894_s28 = smov 64  }
  0x4c   : > { %1853 = dma.hbm_to_vmem [thread:$0]  (!%p2308_p4), %s2317_s12, 1024, %s2320_s11, %s2322_s16, %s2894_s28, %s2894_s28, %s2893_s3  }
  0x4d   : > { %s2157_s13 = smov [#allocation11]   ;;  %p2895_p3 = scmp.ne.s32.totalorder %s2888_s23, 0 }
  0x4e   : > { %s268_s22 = sshll.u32 %s2157_s13, 4  ;;  %s269_s22 = int_to_ptr.vmem [resolvable:$true] %s268_s22 }
  0x4f   : > { %s2008_s10 = scalar_lea.vmem %s269_s22, 1024  ;;  %p2896_p8 = pneg %p2895_p3 }
  0x50   : > { %p2009_p0 = scmp.ne.s32.totalorder %s269_s22, %s2008_s10  ;;  %p2016_p2 = scmp.lt.s32.totalorder %s269_s22, %s269_s22 }
  0x51   : > { %p2017_p7 = scmp.lt.s32.totalorder %s2008_s10, %s2008_s10 }
  0x52   : > { %p2011_p6 = pnand %p2009_p0, %p2896_p8 }
  0x53   : > { %p2018_p9 = por %p2017_p7, %p2016_p2 }
  0x54   : > { %p2012_p13 = pneg %p2011_p6 }
  0x56   : > { %p2019_p10 = pnand %p2018_p9, %p2012_p13 }
  0x58   : > { %2022 = shalt.err (!%p2019_p10)
}
  0x59   : > { %s2897_s4 = sld [smem:[#allocation22_spill]]  ;;  %s2369_s24 = scalar_lea.hbm %s2853_s0, %s2302_s14 }
  0x5a   : > { %s295_s23 = scalar_lea.vmem [#allocation3], %s2286_s25  ;;  %s2898_s10 = sand.u32 1, %s2147_s9  }
  0x5b   : > { %s302_s13 = sshll.u32 %s295_s23, 4  ;;  %s292_s1 = scalar_lea.sflag [#allocation4], %s2898_s10  ;;  %s2372_s13 = int_to_ptr.vmem [resolvable:$true] %s302_s13 }
  0x5c   : > { %s2023_s12 = scalar_lea.hbm %s2369_s24, 1024  ;;  %s2028_s26 = scalar_lea.hbm %s2853_s0, 2048 }
  0x5d   : > { %p2024_p1 = scmp.ne.s32.totalorder %s2369_s24, %s2023_s12  ;;  %p2029_p0 = scmp.lt.s32.totalorder %s2369_s24, %s2853_s0 }
  0x5f   : > { %1846 = dma.hbm_to_vmem [thread:$0]  (!%p2895_p3), %s2897_s4, 1024, %s269_s22, [#allocation10], %s2894_s28, %s2894_s28, %s2893_s3  }
  0x60   : > { %p2026_p5 = pnand %p2024_p1, %p2328_p11  ;;  %p2030_p3 = scmp.lt.s32.totalorder %s2028_s26, %s2023_s12 }
  0x62   : > { %p2027_p12 = pneg %p2026_p5  ;;  %p2031_p8 = por %p2030_p3, %p2029_p0 }
  0x64   : > { %p2032_p6 = pnand %p2031_p8, %p2027_p12 }
  0x66   : > { %2035 = shalt.err (!%p2032_p6)
}
  0x67   : > { %s2036_s23 = scalar_lea.vmem %s2372_s13, 1024  ;;  %s2158_s10 = smov [#allocation3]  }
  0x68   : > { %p2037_p13 = scmp.ne.s32.totalorder %s2372_s13, %s2036_s23  ;;  %s2041_s22 = sshll.u32 %s2158_s10, 4  ;;  %s2042_s22 = int_to_ptr.vmem [resolvable:$false] %s2041_s22 }
  0x69   : > { %s2043_s11 = scalar_lea.vmem %s2042_s22, 2048  ;;  %p2044_p9 = scmp.lt.s32.totalorder %s2372_s13, %s2042_s22 }
  0x6a   : > { %p2039_p2 = pnand %p2037_p13, %p2328_p11  ;;  %p2045_p10 = scmp.lt.s32.totalorder %s2043_s11, %s2036_s23 }
  0x6c   : > { %p2040_p7 = pneg %p2039_p2  ;;  %p2046_p1 = por %p2045_p10, %p2044_p9 }
  0x6e   : > { %p2047_p5 = pnand %p2046_p1, %p2040_p7 }
  0x70   : > { %2050 = shalt.err (!%p2047_p5)
}
  0x71   : > { %1850 = dma.hbm_to_vmem [thread:$0]  (!%p2308_p4), %s2369_s24, 1024, %s2372_s13, %s292_s1, %s2894_s28, %s2894_s28, %s2893_s3  }
  0x72   : > { %s2403_s26 = scalar_lea.hbm %s2855_s2, %s2302_s14  ;;  %s337_s15 = scalar_lea.vmem [#allocation8], %s2286_s25 }
  0x73   : > { %s344_s23 = sshll.u32 %s337_s15, 4  ;;  %s2051_s10 = scalar_lea.hbm %s2403_s26, 1024  ;;  %s345_s23 = int_to_ptr.vmem [resolvable:$true] %s344_s23 }
  0x74   : > { %p2052_p12 = scmp.ne.s32.totalorder %s2403_s26, %s2051_s10  ;;  %s2056_s1 = scalar_lea.hbm %s2855_s2, 2048 }
  0x75   : > { %p2057_p8 = scmp.lt.s32.totalorder %s2403_s26, %s2855_s2  ;;  %p2058_p6 = scmp.lt.s32.totalorder %s2056_s1, %s2051_s10 }
  0x76   : > { %p2054_p0 = pnand %p2052_p12, %p2328_p11 }
  0x77   : > { %p2059_p13 = por %p2058_p6, %p2057_p8 }
  0x78   : > { %p2055_p3 = pneg %p2054_p0 }
  0x7a   : > { %p2060_p2 = pnand %p2059_p13, %p2055_p3 }
  0x7c   : > { %2063 = shalt.err (!%p2060_p2)
}
  0x7d   : > { %s2064_s25 = scalar_lea.vmem %s345_s23, 1024  ;;  %s2159_s14 = smov [#allocation8]  }
  0x7e   : > { %p2065_p7 = scmp.ne.s32.totalorder %s345_s23, %s2064_s25  ;;  %s2069_s4 = sshll.u32 %s2159_s14, 4  ;;  %s2070_s4 = int_to_ptr.vmem [resolvable:$false] %s2069_s4 }
  0x7f   : > { %s2071_s12 = scalar_lea.vmem %s2070_s4, 2048  ;;  %p2072_p1 = scmp.lt.s32.totalorder %s345_s23, %s2070_s4 }
  0x80   : > { %p2067_p9 = pnand %p2065_p7, %p2328_p11  ;;  %p2073_p5 = scmp.lt.s32.totalorder %s2071_s12, %s2064_s25 }
  0x82   : > { %p2068_p10 = pneg %p2067_p9  ;;  %p2074_p12 = por %p2073_p5, %p2072_p1 }
  0x84   : > { %p2075_p0 = pnand %p2074_p12, %p2068_p10 }
  0x86   : > { %2078 = shalt.err (!%p2075_p0)
}
  0x87   : > { %1856 = dma.hbm_to_vmem [thread:$0]  (!%p2308_p4), %s2403_s26, 1024, %s345_s23, %s2322_s16, %s2894_s28, %s2894_s28, %s2893_s3  }
  0x88   : > { %p2899_p11 = scmp.ne.s32.totalorder %s2887_s20, 0 }
  0x89   : > { %s2429_s27 = sand.u32 (!%p2899_p11), 1, %s2143_s30   ;;  %p2900_p3 = scmp.ne.s32.totalorder (!%p2899_p11), %s2884_s17, 0 }
  0x8a   : > { %356 = sbr.rel (%p2899_p11) target bundleno = 630 (0x276), region = 52  ;;  %s1609_s15 = sshll.u32 (!%p2899_p11), %s2429_s27, 6 }
  0x8b   : > { %s359_s10 = scalar_lea.sflag (!%p2899_p11), [#allocation4], %s2429_s27  ;;  %s2433_s22 = scalar_lea.vmem (!%p2899_p11), [#allocation3], %s1609_s15 }
  0x8f   : > { %2122 = dma.done.wait (%p2900_p3), %s359_s10, 1024  }
  0x90   : > { %2124 = vsyncadd (%p2900_p3), %s359_s10, 4294966272  ;;  %s367_s21 = sand.u32 1, %s2230_s7   ;;  %s2440_s16 = scalar_lea.vmem [#allocation6], %s1609_s15 }
  0x91   : > { %s368_s20 = scalar_lea.sflag [#allocation7], %s367_s21 }
  0x92   : > { %2126 = dma.done.wait (%p2900_p3), %s368_s20, 2048  }
  0x93   : > { %2128 = vsyncadd (%p2900_p3), %s368_s20, 4294965248  ;;  %s2446_s3 = scalar_lea.vmem [#allocation8], %s1609_s15  ;;  %p2901_p4 = scmp.eq.s32.totalorder %s2230_s7, 0 }
  0x95   : > { %2130 = dma.done.wait (%p2901_p4), [#allocation10], 2048   ;;  %p2902_p8 = pmov %p2901_p4 }
  0x96   : > { %v1903_v0 = vld [vmem:[#allocation11 + $0x38] sm:$0xff]   ;;  %v1905_v2 = vld [vmem:[#allocation11 + $0x30] sm:$0xff]   ;;  %v1907_v4 = vld [vmem:[#allocation11 + $0x28] sm:$0xff]   ;;  %s435_s11 = sld [smem:[#allocation2]]  ;;  %vm1249_vm0 = vcmask 130112   ;;  %vm1256_vm1 = vcmask 195712  }
  0x97   : > { %2132 = vsyncadd (%p2902_p8), [#allocation10], 4294965248  ;;  %v1904_v1 = vld [vmem:[#allocation9 + $0x38] sm:$0xff]   ;;  %1712 = vmatprep.subr.bf16.mxu0 %v1903_v0  ;;  %v1906_v3 = vld [vmem:[#allocation9 + $0x30] sm:$0xff]   ;;  %vm1263_vm2 = vcmask 261312   ;;  %vm1270_vm3 = vcmask 326912  }
  0x98   : > { %1744 = vmatprep.subr.bf16.mxu1 %v1904_v1  ;;  %1713 = vmatpush3.bf16.msra.mxu0 %v1903_v0  ;;  %v2452_v5 = vld [vmem:[#allocation9 + $0x28] sm:$0xff]   ;;  %v1909_v6 = vld [vmem:[#allocation11 + $0x20] sm:$0xff]   ;;  %v1911_v8 = vld [vmem:[#allocation11 + $0x18] sm:$0xff]   ;;  %vm1277_vm4 = vcmask 392512   ;;  %vm1284_vm5 = vcmask 458112   ;;  %vm1291_vm6 = vcmask 523712  }
  0x99   : > { %1745 = vmatpush3.bf16.msra.mxu1 %v1904_v1  ;;  %1714 = vmatprep.subr.bf16.mxu0 %v1905_v2  ;;  %v2455_v7 = vld [vmem:[#allocation9 + $0x20] sm:$0xff]   ;;  %v2459_v9 = vld [vmem:[#allocation9 + $0x18] sm:$0xff]   ;;  %v1913_v10 = vld [vmem:[#allocation11 + $0x10] sm:$0xff]   ;;  %vm1298_vm7 = vcmask 589312   ;;  %vm1305_vm8 = vcmask 654912   ;;  %vm1312_vm9 = vcmask 720512  }
  0x9a   : > { %1746 = vmatprep.subr.bf16.mxu1 %v1906_v3  ;;  %v2461_v11 = vld [vmem:[#allocation9 + $0x10] sm:$0xff]   ;;  %v1919_v12 = vld [vmem:[%s2446_s3] sm:$0xff]   ;;  %v1915_v14 = vld [vmem:[#allocation11 + $0x8] sm:$0xff]   ;;  %vm1319_vm10 = vcmask 786112   ;;  %vm1326_vm11 = vcmask 851712   ;;  %vm1333_vm12 = vcmask 917312  }
  0x9b   : > { %v1920_v13 = vld [vmem:[%s2433_s22] sm:$0xff]   ;;  %1728 = vmatprep.mubr.bf16.mxu0 %v1919_v12  ;;  %v2469_v15 = vld [vmem:[#allocation9 + $0x8] sm:$0xff]   ;;  %v1923_v20 = vld [vmem:[%s2446_s3 + $0x10] sm:$0xff]   ;;  %s1614_s1 = sshll.u32 %s2429_s27, 1  ;;  %vm1340_vm13 = vcmask 982912   ;;  %vm1347_vm14 = vcmask 1048512  }
  0x9c   : > { %1715 = vmatpush3.bf16.msra.mxu0 %v1905_v2  ;;  %1760 = vmatprep.mubr.bf16.mxu1 %v1920_v13  ;;  %v1917_v16 = vld [vmem:[#allocation11] sm:$0xff]   ;;  %v1921_v18 = vld [vmem:[%s2446_s3 + $0x8] sm:$0xff]   ;;  %v1924_v21 = vld [vmem:[%s2433_s22 + $0x10] sm:$0xff]   ;;  %s2754_s24 = scalar_lea.vmem [#allocation12], %s1614_s1  ;;  %s1658_s13 = sshll.u32 %s2230_s7, 5 }
  0x9d   : > { %1747 = vmatpush3.bf16.msra.mxu1 %v1906_v3  ;;  %1716 = vmatprep.subr.bf16.mxu0 %v1907_v4  ;;  %v2473_v17 = vld [vmem:[#allocation9] sm:$0xff]   ;;  %v1922_v19 = vld [vmem:[%s2433_s22 + $0x8] sm:$0xff]   ;;  %v1925_v22 = vld [vmem:[%s2446_s3 + $0x18] sm:$0xff]   ;;  %s1462_s25 = sshll.u32 %s2754_s24, 4  ;;  %s2814_s12 = scalar_lea.hbm %s2861_s8, %s1658_s13  ;;  %s1463_s25 = int_to_ptr.vmem [resolvable:$true] %s1462_s25 }
  0x9e   : > { %1748 = vmatprep.subr.bf16.mxu1 %v2452_v5  ;;  %v1926_v23 = vld [vmem:[%s2433_s22 + $0x18] sm:$0xff]   ;;  %v1927_v24 = vld [vmem:[%s2446_s3 + $0x20] sm:$0xff]   ;;  %v1929_v26 = vld [vmem:[%s2446_s3 + $0x28] sm:$0xff]   ;;  %s1449_s15 = scalar_lea.sflag [#allocation5], %s2429_s27  ;;  %s2079_s10 = scalar_lea.vmem %s1463_s25, 32 }
  0x9f   : > { %v1928_v25 = vld [vmem:[%s2433_s22 + $0x20] sm:$0xff]   ;;  %v1930_v27 = vld [vmem:[%s2433_s22 + $0x28] sm:$0xff]   ;;  %v1931_v28 = vld [vmem:[%s2446_s3 + $0x30] sm:$0xff]   ;;  %p2080_p6 = scmp.ne.s32.totalorder %s1463_s25, %s2079_s10  ;;  %p2903_p13 = scmp.ne.s32.totalorder %s2885_s18, 0 }
  0xa0   : > { %1717 = vmatpush3.bf16.msra.mxu0 %v1907_v4  ;;  %v1932_v29 = vld [vmem:[%s2433_s22 + $0x30] sm:$0xff]   ;;  %v1933_v30 = vld [vmem:[%s2446_s3 + $0x38] sm:$0xff]   ;;  %v1935_v32 = vld [vmem:[%s2440_s16] sm:$0xff]   ;;  %s2160_s7 = smov [#allocation12]  }
  0xa1   : > { %1749 = vmatpush3.bf16.msra.mxu1 %v2452_v5  ;;  %1718 = vmatprep.subr.bf16.mxu0 %v1909_v6  ;;  %v1934_v31 = vld [vmem:[%s2433_s22 + $0x38] sm:$0xff]   ;;  %v1936_v33 = vld [vmem:[%s2440_s16 + $0x20] sm:$0xff]   ;;  %v1937_v34 = vld [vmem:[%s2440_s16 + $0x8] sm:$0xff]   ;;  %p2081_p2 = pnand %p2080_p6, %p2903_p13  ;;  %s2083_s22 = sshll.u32 %s2160_s7, 4  ;;  %s2084_s22 = int_to_ptr.vmem [resolvable:$false] %s2083_s22 }
  0xa2   : > { %1750 = vmatprep.subr.bf16.mxu1 %v2455_v7  ;;  %v1938_v35 = vld [vmem:[%s2440_s16 + $0x28] sm:$0xff]   ;;  %v1939_v36 = vld [vmem:[%s2440_s16 + $0x10] sm:$0xff]   ;;  %v1941_v38 = vld [vmem:[%s2440_s16 + $0x18] sm:$0xff]   ;;  %s2085_s21 = scalar_lea.vmem %s2084_s22, 64  ;;  %p2086_p9 = scmp.lt.s32.totalorder %s1463_s25, %s2084_s22 }
  0xa3   : > { %v1940_v37 = vld [vmem:[%s2440_s16 + $0x30] sm:$0xff]   ;;  %v1942_v39 = vld [vmem:[%s2440_s16 + $0x38] sm:$0xff]   ;;  %v2527_v40 = vld [vmem:[%s2858_s5] ss:$0 sm:$0xff]  ;;  %p2082_p7 = pneg %p2081_p2  ;;  %p2087_p10 = scmp.lt.s32.totalorder %s2085_s21, %s2079_s10 }
  0xa4   : > { %1719 = vmatpush3.bf16.msra.mxu0 %v1909_v6  ;;  %v2539_v49 = vld [vmem:[%s2859_s6] ss:$0 sm:$0xff] }
  0xa5   : > { %1751 = vmatpush3.bf16.msra.mxu1 %v2455_v7  ;;  %1720 = vmatprep.subr.bf16.mxu0 %v1911_v8  ;;  %p2088_p1 = por %p2087_p10, %p2086_p9 }
  0xa6   : > { %1752 = vmatprep.subr.bf16.mxu1 %v2459_v9 }
  0xa7   : > { %p2089_p5 = pnand %p2088_p1, %p2082_p7 }
  0xa8   : > { %1721 = vmatpush3.bf16.msra.mxu0 %v1911_v8 }
  0xa9   : > { %1753 = vmatpush3.bf16.msra.mxu1 %v2459_v9  ;;  %1722 = vmatprep.subr.bf16.mxu0 %v1913_v10 }
  0xaa   : > { %1754 = vmatprep.subr.bf16.mxu1 %v2461_v11 }
  0xac   : > { %1723 = vmatpush3.bf16.msra.mxu0 %v1913_v10 }
  0xad   : > { %1755 = vmatpush3.bf16.msra.mxu1 %v2461_v11  ;;  %1724 = vmatprep.subr.bf16.mxu0 %v1915_v14 }
  0xae   : > { %1756 = vmatprep.subr.bf16.mxu1 %v2469_v15 }
  0xb0   : > { %1725 = vmatpush3.bf16.msra.mxu0 %v1915_v14 }
  0xb1   : > { %1757 = vmatpush3.bf16.msra.mxu1 %v2469_v15  ;;  %1726 = vmatprep.subr.bf16.mxu0 %v1917_v16 }
  0xb2   : > { %1758 = vmatprep.subr.bf16.mxu1 %v2473_v17 }
  0xb4   : > { %1727 = vmatpush3.bf16.msra.mxu0 %v1917_v16 }
  0xb5   : > { %1759 = vmatpush3.bf16.msra.mxu1 %v2473_v17  ;;  %1776 = vmatprep.subr.bf16.mxu0 %v1904_v1 }
  0xb6   : > { %1808 = vmatprep.subr.bf16.mxu1 %v1904_v1 }
  0xb7   : > { %1729 = vmatmul.mubr.bf16.vlgmr.msra.gmra.mxu0 %v1921_v18 }
  0xb8   : > { %1761 = vmatmul.mubr.bf16.vlgmr.msra.gmra.mxu1 %v1922_v19  ;;  %1777 = vmatpush3.bf16.msra.mxu0 %v1904_v1 }
  0xb9   : > { %1816 = vmatpush3.bf16.msra.mxu1 %v1904_v1  ;;  %1778 = vmatprep.subr.bf16.mxu0 %v1906_v3 }
  0xba   : > { %1809 = vmatprep.subr.bf16.mxu1 %v1906_v3  ;;  %1732 = vmatprep.mubr.bf16.mxu0 %v1923_v20 }
  0xbb   : > { %1764 = vmatprep.mubr.bf16.mxu1 %v1924_v21 }
  0xbc   : > { %1779 = vmatpush3.bf16.msra.mxu0 %v1906_v3 }
  0xbd   : > { %1817 = vmatpush3.bf16.msra.mxu1 %v1906_v3  ;;  %1780 = vmatprep.subr.bf16.mxu0 %v2452_v5 }
  0xbe   : > { %1810 = vmatprep.subr.bf16.mxu1 %v2452_v5 }
  0xbf   : > { %1733 = vmatmul.mubr.bf16.gmra.mxu0 %v1925_v22 }
  0xc0   : > { %1765 = vmatmul.mubr.bf16.gmra.mxu1 %v1926_v23  ;;  %1781 = vmatpush3.bf16.msra.mxu0 %v2452_v5 }
  0xc1   : > { %1818 = vmatpush3.bf16.msra.mxu1 %v2452_v5  ;;  %1782 = vmatprep.subr.bf16.mxu0 %v2455_v7 }
  0xc2   : > { %1811 = vmatprep.subr.bf16.mxu1 %v2455_v7  ;;  %1736 = vmatprep.mubr.bf16.mxu0 %v1927_v24 }
  0xc3   : > { %1768 = vmatprep.mubr.bf16.mxu1 %v1928_v25 }
  0xc4   : > { %1783 = vmatpush3.bf16.msra.mxu0 %v2455_v7 }
  0xc5   : > { %1819 = vmatpush3.bf16.msra.mxu1 %v2455_v7  ;;  %1784 = vmatprep.subr.bf16.mxu0 %v2459_v9 }
  0xc6   : > { %1812 = vmatprep.subr.bf16.mxu1 %v2459_v9 }
  0xc7   : > { %1737 = vmatmul.mubr.bf16.gmra.mxu0 %v1929_v26 }
  0xc8   : > { %1769 = vmatmul.mubr.bf16.gmra.mxu1 %v1930_v27  ;;  %1785 = vmatpush3.bf16.msra.mxu0 %v2459_v9 }
  0xc9   : > { %1820 = vmatpush3.bf16.msra.mxu1 %v2459_v9  ;;  %1786 = vmatprep.subr.bf16.mxu0 %v2461_v11 }
  0xca   : > { %1813 = vmatprep.subr.bf16.mxu1 %v2461_v11  ;;  %1740 = vmatprep.mubr.bf16.mxu0 %v1931_v28 }
  0xcb   : > { %1772 = vmatprep.mubr.bf16.mxu1 %v1932_v29 }
  0xcc   : > { %1787 = vmatpush3.bf16.msra.mxu0 %v2461_v11 }
  0xcd   : > { %1821 = vmatpush3.bf16.msra.mxu1 %v2461_v11  ;;  %1788 = vmatprep.subr.bf16.mxu0 %v2469_v15 }
  0xce   : > { %1814 = vmatprep.subr.bf16.mxu1 %v2469_v15 }
  0xcf   : > { %1741 = vmatmul.mubr.bf16.gmra.mxu0 %v1933_v30 }
  0xd0   : > { %1773 = vmatmul.mubr.bf16.gmra.mxu1 %v1934_v31  ;;  %1789 = vmatpush3.bf16.msra.mxu0 %v2469_v15 }
  0xd1   : > { %1822 = vmatpush3.bf16.msra.mxu1 %v2469_v15  ;;  %1790 = vmatprep.subr.bf16.mxu0 %v2473_v17 }
  0xd2   : > { %1815 = vmatprep.subr.bf16.mxu1 %v2473_v17  ;;  %1792 = vmatprep.mubr.bf16.mxu0 %v1935_v32 }
  0xd3   : > { %1800 = vmatprep.mubr.bf16.mxu1 %v1936_v33 }
  0xd4   : > { %1791 = vmatpush3.bf16.msra.mxu0 %v2473_v17 }
  0xd5   : > { %1823 = vmatpush3.bf16.msra.mxu1 %v2473_v17 }
  0xd7   : > { %1793 = vmatmul.mubr.bf16.vlgmr.msra.gmra.mxu0 %v1937_v34 }
  0xd8   : > { %1801 = vmatmul.mubr.bf16.vlgmr.msra.gmra.mxu1 %v1938_v35  ;;  %1796 = vmatprep.mubr.bf16.mxu0 %v1939_v36 }
  0xd9   : > { %1804 = vmatprep.mubr.bf16.mxu1 %v1940_v37 }
  0xdf   : > { %1797 = vmatmul.mubr.bf16.gmra.mxu0 %v1941_v38 }
  0xe0   : > { %1805 = vmatmul.mubr.bf16.gmra.mxu1 %v1942_v39 }
 0x177   : > { %v1730_v41 = vpop.f32.mrf.mxu0 }
 0x178   : > { %v2530_v42 = vadd.f32 %v1730_v41, %v2527_v40  ;;  %v1762_v43 = vpop.f32.mrf.mxu1 }
 0x179   : > { %v606_v44 = vpop.f32.mrf.mxu0 }
 0x17a   : > { %v840_v45 = vadd.f32 %v1762_v43, %v2530_v42  ;;  %v2534_v46 = vadd.f32 %v2527_v40, %v606_v44  ;;  %v831_v47 = vpop.f32.mrf.mxu1 }
 0x17b   : > { %v1731_v48 = vpop.f32.mrf.mxu0 }
 0x17c   : > { %v896_v50 = vmax.f32 %v840_v45, 0.0  ;;  %v832_v51 = vadd.f32 %v831_v47, %v2534_v46  ;;  %v2543_v52 = vadd.f32 %v1731_v48, %v2527_v40  ;;  %v1763_v53 = vpop.f32.mrf.mxu1 }
 0x17d   : > { %v609_v54 = vpop.f32.mrf.mxu0 }
 0x17e   : > { %v894_v55 = vmax.f32 %v832_v51, 0.0  ;;  %v843_v56 = vadd.f32 %v1763_v53, %v2543_v52  ;;  %v2547_v57 = vadd.f32 %v2527_v40, %v609_v54  ;;  %v834_v58 = vpop.f32.mrf.mxu1  ;;  %v1095_v59 = vmul.f32 %v2539_v49, %v896_v50 }
 0x17f   : > { %v1734_v60 = vpop.f32.mrf.mxu0 }
 0x180   : > { %v1766_v61 = vpop.f32.mrf.mxu1  ;;  %1113 = vadd.xlane.f32.xlu0 %v1095_v59  ;;  %v897_v63 = vmax.f32 %v843_v56, 0.0  ;;  %v835_v0 = vadd.f32 %v834_v58, %v2547_v57  ;;  %v2552_v1 = vadd.f32 %v1734_v60, %v2527_v40  ;;  %v1093_v3 = vmul.f32 %v2539_v49, %v894_v55 }
 0x181   : > { %v622_v62 = vpop.f32.mrf.mxu0 }
 0x182   : > { %v847_v2 = vpop.f32.mrf.mxu1  ;;  %v895_v7 = vmax.f32 %v835_v0, 0.0  ;;  %v856_v8 = vadd.f32 %v1766_v61, %v2552_v1  ;;  %v2557_v9 = vadd.f32 %v2527_v40, %v622_v62  ;;  %v1096_v11 = vmul.f32 %v2539_v49, %v897_v63 }
 0x183   : > { %v1735_v4 = vpop.f32.mrf.mxu0 }
 0x184   : > { %v1767_v5 = vpop.f32.mrf.mxu1  ;;  %1109 = vadd.xlane.f32.xlu0 %v1093_v3  ;;  %v900_v15 = vmax.f32 %v856_v8, 0.0  ;;  %v848_v16 = vadd.f32 %v847_v2, %v2557_v9  ;;  %v2562_v17 = vadd.f32 %v1735_v4, %v2527_v40  ;;  %v1094_v19 = vmul.f32 %v2539_v49, %v895_v7 }
 0x185   : > { %v625_v6 = vpop.f32.mrf.mxu0 }
 0x186   : > { %v850_v10 = vpop.f32.mrf.mxu1  ;;  %v898_v23 = vmax.f32 %v848_v16, 0.0  ;;  %v859_v24 = vadd.f32 %v1767_v5, %v2562_v17  ;;  %v2567_v25 = vadd.f32 %v2527_v40, %v625_v6  ;;  %v1099_v27 = vmul.f32 %v2539_v49, %v900_v15 }
 0x187   : > { %v1738_v12 = vpop.f32.mrf.mxu0 }
 0x188   : > { %v1770_v13 = vpop.f32.mrf.mxu1  ;;  %1115 = vadd.xlane.f32.xlu0 %v1096_v11  ;;  %v647_v30 = vadd.f32 %v1738_v12, %v2527_v40  ;;  %v901_v32 = vmax.f32 %v859_v24, 0.0  ;;  %v851_v33 = vadd.f32 %v850_v10, %v2567_v25  ;;  %v1097_v35 = vmul.f32 %v2539_v49, %v898_v23 }
 0x189   : > { %v638_v14 = vpop.f32.mrf.mxu0 }
 0x18a   : > { %v863_v18 = vpop.f32.mrf.mxu1  ;;  %v872_v38 = vadd.f32 %v1770_v13, %v647_v30  ;;  %v899_v41 = vmax.f32 %v851_v33, 0.0  ;;  %v639_v43 = vadd.f32 %v2527_v40, %v638_v14  ;;  %v1100_v45 = vmul.f32 %v2539_v49, %v901_v32 }
 0x18b   : > { %v1739_v20 = vpop.f32.mrf.mxu0 }
 0x18c   : > { %v1771_v21 = vpop.f32.mrf.mxu1  ;;  %1111 = vadd.xlane.f32.xlu0 %v1094_v19  ;;  %v904_v51 = vmax.f32 %v872_v38, 0.0  ;;  %v864_v55 = vadd.f32 %v863_v18, %v639_v43  ;;  %v650_v56 = vadd.f32 %v1739_v20, %v2527_v40  ;;  %v1098_v59 = vmul.f32 %v2539_v49, %v899_v41 }
 0x18d   : > { %v641_v22 = vpop.f32.mrf.mxu0 }
 0x18e   : > { %v866_v26 = vpop.f32.mrf.mxu1  ;;  %v902_v0 = vmax.f32 %v864_v55, 0.0  ;;  %v642_v2 = vadd.f32 %v2527_v40, %v641_v22  ;;  %v1103_v3 = vmul.f32 %v2539_v49, %v904_v51 }
 0x18f   : > { %v1742_v28 = vpop.f32.mrf.mxu0 }
 0x190   : > { %v1774_v29 = vpop.f32.mrf.mxu1  ;;  %1121 = vadd.xlane.f32.xlu0 %v1099_v27  ;;  %v867_v10 = vadd.f32 %v866_v26, %v642_v2  ;;  %v1101_v11 = vmul.f32 %v2539_v49, %v902_v0 }
 0x191   : > { %v654_v31 = vpop.f32.mrf.mxu0 }
 0x192   : > { %v879_v34 = vpop.f32.mrf.mxu1  ;;  %v903_v16 = vmax.f32 %v867_v10, 0.0  ;;  %v655_v19 = vadd.f32 %v2527_v40, %v654_v31 }
 0x193   : > { %v2573_v36 = vpop.f32.mrf.mxu0 }
 0x194   : > { %v2575_v37 = vpop.f32.mrf.mxu1  ;;  %1117 = vadd.xlane.f32.xlu0 %v1097_v35  ;;  %v666_v35 = vadd.f32 %v2573_v36, %v2527_v40 }
 0x195   : > { %v657_v39 = vpop.f32.mrf.mxu0 }
 0x196   : > { %v882_v44 = vpop.f32.mrf.mxu1  ;;  %v658_v27 = vadd.f32 %v2527_v40, %v657_v39 }
 0x197   : > { %v1794_v47 = vpop.f32.mrf.mxu0 }
 0x198   : > { %v1017_v48 = vadd.f32 %v1794_v47, %v2530_v42  ;;  %v1802_v50 = vpop.f32.mrf.mxu1  ;;  %1123 = vadd.xlane.f32.xlu0 %v1100_v45  ;;  %v875_v42 = vadd.f32 %v1771_v21, %v650_v56  ;;  %v883_v38 = vadd.f32 %v882_v44, %v658_v27 }
 0x199   : > { %v1049_v53 = vadd.f32 %v1802_v50, %v647_v30  ;;  %v1008_v54 = vpop.f32.mrf.mxu0 }
 0x19a   : > { %v1073_v58 = vmax.f32 %v1017_v48, 0.0  ;;  %v1009_v61 = vadd.f32 %v1008_v54, %v2534_v46  ;;  %v1040_v63 = vpop.f32.mrf.mxu1  ;;  %v905_v8 = vmax.f32 %v875_v42, 0.0  ;;  %v2588_v46 = vadd.f32 %v1742_v28, %v2527_v40 }
 0x19b   : > { %v1081_v60 = vmax.f32 %v1049_v53, 0.0  ;;  %v1041_v5 = vadd.f32 %v1040_v63, %v639_v43  ;;  %v1795_v7 = vpop.f32.mrf.mxu0  ;;  %v1102_v28 = vmul.f32 %v2539_v49, %v903_v16  ;;  %v907_v47 = vmax.f32 %v883_v38, 0.0 }
 0x19c   : > { %1119 = vadd.xlane.f32.xlu0 %v1098_v59  ;;  %v1160_v62 = vmul.f32 %v2539_v49, %v1073_v58  ;;  %v1071_v4 = vmax.f32 %v1009_v61, 0.0  ;;  %v1020_v13 = vadd.f32 %v1795_v7, %v2543_v52  ;;  %v1803_v15 = vpop.f32.mrf.mxu1  ;;  %v888_v18 = vadd.f32 %v1774_v29, %v2588_v46 }
 0x19d   : > { %v1168_v6 = vmul.f32 %v2539_v49, %v1081_v60  ;;  %v1079_v12 = vmax.f32 %v1041_v5, 0.0  ;;  %v1104_v20 = vmul.f32 %v2539_v49, %v905_v8  ;;  %v1052_v22 = vadd.f32 %v1803_v15, %v650_v56  ;;  %v1011_v24 = vpop.f32.mrf.mxu0 }
 0x19e   : > { %1178 = vadd.xlane.f32.xlu1 %v1160_v62  ;;  %v1158_v14 = vmul.f32 %v2539_v49, %v1071_v4  ;;  %v1074_v21 = vmax.f32 %v1020_v13, 0.0  ;;  %v908_v26 = vmax.f32 %v888_v18, 0.0  ;;  %v880_v52 = vadd.f32 %v879_v34, %v655_v19  ;;  %v1043_v32 = vpop.f32.mrf.mxu1 }
 0x19f   : > { %v1166_v23 = vmul.f32 %v2539_v49, %v1079_v12  ;;  %v1082_v30 = vmax.f32 %v1052_v22, 0.0  ;;  %v1012_v29 = vadd.f32 %v1011_v24, %v2547_v57  ;;  %v1044_v39 = vadd.f32 %v1043_v32, %v642_v2  ;;  %v1798_v45 = vpop.f32.mrf.mxu0 }
 0x1a0   : > { %1129 = vadd.xlane.f32.xlu0 %v1103_v3  ;;  %v1161_v31 = vmul.f32 %v2539_v49, %v1074_v21  ;;  %v906_v33 = vmax.f32 %v880_v52, 0.0  ;;  %v1107_v34 = vmul.f32 %v2539_v49, %v908_v26  ;;  %v891_v57 = vadd.f32 %v2575_v37, %v666_v35  ;;  %v1806_v36 = vpop.f32.mrf.mxu1 }
 0x1a1   : > { %v1072_v41 = vmax.f32 %v1012_v29, 0.0  ;;  %v1169_v43 = vmul.f32 %v2539_v49, %v1082_v30  ;;  %v1080_v50 = vmax.f32 %v1044_v39, 0.0  ;;  %v1033_v51 = vadd.f32 %v1798_v45, %v2552_v1  ;;  %v1024_v44 = vpop.f32.mrf.mxu0 }
 0x1a2   : > { %1194 = vadd.xlane.f32.xlu1 %v1168_v6  ;;  %v1105_v48 = vmul.f32 %v2539_v49, %v906_v33  ;;  %v909_v53 = vmax.f32 %v891_v57, 0.0  ;;  %v1106_v54 = vmul.f32 %v2539_v49, %v907_v47  ;;  %v1025_v56 = vadd.f32 %v1024_v44, %v2557_v9  ;;  %v1056_v58 = vpop.f32.mrf.mxu1 }
 0x1a3   : > { %v1159_v40 = vmul.f32 %v2539_v49, %v1072_v41  ;;  %v1077_v55 = vmax.f32 %v1033_v51, 0.0  ;;  %v1167_v37 = vmul.f32 %v2539_v49, %v1080_v50  ;;  %v1057_v60 = vadd.f32 %v1056_v58, %v655_v19  ;;  %v1799_v62 = vpop.f32.mrf.mxu0 }
 0x1a4   : > { %1125 = vadd.xlane.f32.xlu0 %v1101_v11  ;;  %v1108_v59 = vmul.f32 %v2539_v49, %v909_v53  ;;  %v1075_v1 = vmax.f32 %v1025_v56, 0.0  ;;  %v1036_v0 = vadd.f32 %v1799_v62, %v2562_v17  ;;  %v1807_v5 = vpop.f32.mrf.mxu1  ;;  %v1065_v6 = vadd.f32 %v1806_v36, %v2588_v46 }
 0x1a5   : > { %v1164_v61 = vmul.f32 %v2539_v49, %v1077_v55  ;;  %v1083_v63 = vmax.f32 %v1057_v60, 0.0  ;;  %v1027_v9 = vpop.f32.mrf.mxu0  ;;  %v1068_v13 = vadd.f32 %v1807_v5, %v666_v35  ;;  %v2629_v30 = vstv %s435_s11 }
 0x1a6   : > { %1174 = vadd.xlane.f32.xlu1 %v1158_v14  ;;  %v1162_v42 = vmul.f32 %v2539_v49, %v1075_v1  ;;  %v1078_v2 = vmax.f32 %v1036_v0, 0.0  ;;  %v1028_v3 = vadd.f32 %v1027_v9, %v2567_v25  ;;  %v1059_v10 = vpop.f32.mrf.mxu1  ;;  %v1085_v11 = vmax.f32 %v1065_v6, 0.0 }
 0x1a7   : > { %v1170_v4 = vmul.f32 %v2539_v49, %v1083_v63  ;;  %v1060_v17 = vadd.f32 %v1059_v10, %v658_v27  ;;  %v1086_v15 = vmax.f32 %v1068_v13, 0.0 }
 0x1a8   : > { %1131 = vadd.xlane.f32.xlu0 %v1104_v20  ;;  %v1076_v7 = vmax.f32 %v1028_v3, 0.0  ;;  %v1165_v8 = vmul.f32 %v2539_v49, %v1078_v2  ;;  %v1172_v25 = vmul.f32 %v2539_v49, %v1085_v11 }
 0x1a9   : > { %v1084_v14 = vmax.f32 %v1060_v17, 0.0  ;;  %v1173_v46 = vmul.f32 %v2539_v49, %v1086_v15 }
 0x1aa   : > { %1190 = vadd.xlane.f32.xlu1 %v1166_v23  ;;  %v1163_v12 = vmul.f32 %v2539_v49, %v1076_v7  ;;  %v1238_v23 = vlaneseq }
 0x1ab   : > { %v1171_v16 = vmul.f32 %v2539_v49, %v1084_v14 }
 0x1ac   : > { %1127 = vadd.xlane.f32.xlu0 %v1102_v28  ;;  %v2624_v26 = vand.u32 127, %v1238_v23  ;;  %v2627_v28 = vshrl.u32 %v1238_v23, 7 }
 0x1ae   : > { %1180 = vadd.xlane.f32.xlu1 %v1161_v31  ;;  %v1244_v27 = vadd.s32 4294967288, %v2624_v26  ;;  %v1251_v32 = vadd.s32 4294967280, %v2624_v26  ;;  %v2640_v35 = vsub.s32 %v2624_v26, %v2627_v28  ;;  %v1265_v41 = vadd.s32 4294967264, %v2624_v26 }
 0x1af   : > { %v1272_v45 = vadd.s32 4294967256, %v2624_v26  ;;  %v1279_v58 = vadd.s32 4294967248, %v2624_v26  ;;  %v1286_v1 = vadd.s32 4294967240, %v2624_v26  ;;  %v1293_v62 = vadd.s32 4294967232, %v2624_v26 }
 0x1b0   : > { %1137 = vadd.xlane.f32.xlu0 %v1107_v34  ;;  %v2632_v49 = vsub.s32 %v1244_v27, %v2627_v28  ;;  %v1258_v34 = vadd.s32 4294967272, %v2624_v26  ;;  %v2648_v57 = vsub.s32 %v1251_v32, %v2627_v28  ;;  %v1300_v9 = vadd.s32 4294967224, %v2624_v26 }
 0x1b1   : > { %v2664_v55 = vsub.s32 %v1272_v45, %v2627_v28  ;;  %v2679_v2 = vsub.s32 %v1279_v58, %v2627_v28  ;;  %v2686_v6 = vsub.s32 %v1286_v1, %v2627_v28  ;;  %v1307_v15 = vadd.s32 4294967216, %v2624_v26 }
 0x1b2   : > { %1196 = vadd.xlane.f32.xlu1 %v1169_v43  ;;  %v2655_v51 = vsub.s32 %v1258_v34, %v2627_v28  ;;  %v2696_v13 = vsub.s32 %v1300_v9, %v2627_v28 }
 0x1b4   : > { %1133 = vadd.xlane.f32.xlu0 %v1105_v48 }
 0x1b6   : > { %1176 = vadd.xlane.f32.xlu1 %v1159_v40  ;;  %v2658_v40 = vsub.s32 %v1265_v41, %v2627_v28 }
 0x1b8   : > { %1135 = vadd.xlane.f32.xlu0 %v1106_v54 }
 0x1ba   : > { %1192 = vadd.xlane.f32.xlu1 %v1167_v37 }
 0x1bc   : > { %1139 = vadd.xlane.f32.xlu0 %v1108_v59 }
 0x1be   : > { %1186 = vadd.xlane.f32.xlu1 %v1164_v61 }
 0x1c2   : > { %1182 = vadd.xlane.f32.xlu1 %v1162_v42 }
 0x1c6   : > { %1198 = vadd.xlane.f32.xlu1 %v1170_v4 }
 0x1ca   : > { %1188 = vadd.xlane.f32.xlu1 %v1165_v8  ;;  %v2690_v8 = vsub.s32 %v1293_v62, %v2627_v28 }
 0x1ce   : > { %1184 = vadd.xlane.f32.xlu1 %v1163_v12 }
 0x1d2   : > { %1202 = vadd.xlane.f32.xlu1 %v1172_v25 }
 0x1d6   : > { %1200 = vadd.xlane.f32.xlu1 %v1171_v16 }
 0x1da   : > { %1204 = vadd.xlane.f32.xlu1 %v1173_v46 }
 0x209   : > { %v1114_v18 = vpop.xlane.xlu0 %1113 }
 0x20a   : > { %v1144_v47 = vadd.f32 %v2629_v30, %v1114_v18 }
 0x20c   : > { %v1255_v37 = vrot.slane %v1144_v47, %v2648_v57 }
 0x20d   : > { %v1110_v19 = vpop.xlane.xlu0 %1109 }
 0x20e   : > { %v1142_v38 = vadd.f32 %v2629_v30, %v1110_v19  ;;  %v1314_v19 = vadd.s32 4294967208, %v2624_v26 }
 0x210   : > { %v1243_v50 = vrot.slane %v1142_v38, %v2640_v35  ;;  %v2719_v38 = vsub.s32 %v1314_v19, %v2627_v28 }
 0x211   : > { %v1116_v20 = vpop.xlane.xlu0 %1115 }
 0x212   : > { %v1145_v53 = vadd.f32 %v2629_v30, %v1116_v20 }
 0x214   : > { %v1262_v0 = vrot.slane %v1145_v53, %v2655_v51  ;;  %v1342_v53 = vadd.s32 4294967176, %v2624_v26 }
 0x215   : > { %v1112_v21 = vpop.xlane.xlu0 %1111 }
 0x216   : > { %v1143_v31 = vadd.f32 %v2629_v30, %v1112_v21  ;;  %v1321_v21 = vadd.s32 4294967200, %v2624_v26 }
 0x218   : > { %v1248_v43 = vrot.slane %v1143_v31, %v2632_v49  ;;  %v1328_v31 = vadd.s32 4294967192, %v2624_v26  ;;  %v2722_v34 = vsub.s32 %v1321_v21, %v2627_v28 }
 0x219   : > { %v1122_v22 = vpop.xlane.xlu0 %1121 }
 0x21a   : > { %v1250_v54 = vsel %vm1249_vm0, %v1248_v43, %v1243_v50  ;;  %v1148_v3 = vadd.f32 %v2629_v30, %v1122_v22  ;;  %v1335_v50 = vadd.s32 4294967184, %v2624_v26 }
 0x21b   : > { %v1257_v60 = vsel %vm1256_vm1, %v1255_v37, %v1250_v54 }
 0x21c   : > { %v1264_v5 = vsel %vm1263_vm2, %v1262_v0, %v1257_v60  ;;  %v1283_v25 = vrot.slane %v1148_v3, %v2679_v2  ;;  %v2738_v60 = vsub.s32 %v1335_v50, %v2627_v28  ;;  %v2744_v0 = vsub.s32 %v1342_v53, %v2627_v28 }
 0x21d   : > { %v1118_v24 = vpop.xlane.xlu0 %1117 }
 0x21e   : > { %v1146_v36 = vadd.f32 %v2629_v30, %v1118_v24  ;;  %v2710_v24 = vsub.s32 %v1307_v15, %v2627_v28 }
 0x220   : > { %v1269_v61 = vrot.slane %v1146_v36, %v2658_v40 }
 0x221   : > { %v1124_v52 = vpop.xlane.xlu0 %1123 }
 0x222   : > { %v1271_v7 = vsel %vm1270_vm3, %v1269_v61, %v1264_v5  ;;  %v1149_v17 = vadd.f32 %v2629_v30, %v1124_v52 }
 0x224   : > { %v1290_v22 = vrot.slane %v1149_v17, %v2686_v6 }
 0x225   : > { %v1120_v29 = vpop.xlane.xlu0 %1119 }
 0x226   : > { %v1147_v56 = vadd.f32 %v2629_v30, %v1120_v29 }
 0x227   : > { %v2636_v33 = vpop.xlane.xlu1 %1178 }
 0x228   : > { %v1276_v42 = vrot.slane %v1147_v56, %v2664_v55 }
 0x229   : > { %v1130_v39 = vpop.xlane.xlu0 %1129 }
 0x22a   : > { %v1278_v12 = vsel %vm1277_vm4, %v1276_v42, %v1271_v7  ;;  %v1152_v52 = vadd.f32 %v2629_v30, %v1130_v39 }
 0x22b   : > { %v2651_v48 = vpop.xlane.xlu1 %1194  ;;  %v1285_v46 = vsel %vm1284_vm5, %v1283_v25, %v1278_v12 }
 0x22c   : > { %v1292_v29 = vsel %vm1291_vm6, %v1290_v22, %v1285_v46  ;;  %v1311_v47 = vrot.slane %v1152_v52, %v2710_v24 }
 0x22d   : > { %v1126_v44 = vpop.xlane.xlu0 %1125 }
 0x22e   : > { %v1150_v10 = vadd.f32 %v2629_v30, %v1126_v44  ;;  %v2730_v44 = vsub.s32 %v1328_v31, %v2627_v28 }
 0x22f   : > { %v2669_v59 = vpop.xlane.xlu1 %1174 }
 0x230   : > { %v1297_v18 = vrot.slane %v1150_v10, %v2690_v8  ;;  %v1206_v25 = vadd.f32 %v2669_v59, %v2629_v30 }
 0x231   : > { %v1132_v63 = vpop.xlane.xlu0 %1131 }
 0x232   : > { %v1299_v32 = vsel %vm1298_vm7, %v1297_v18, %v1292_v29  ;;  %v1153_v43 = vadd.f32 %v2629_v30, %v1132_v63  ;;  %v1208_v18 = vadd.f32 %v2636_v33, %v2629_v30  ;;  %v1370_v19 = vrot.slane %v1206_v25, %v2640_v35 }
 0x233   : > { %v2682_v4 = vpop.xlane.xlu1 %1190 }
 0x234   : > { %v1318_v58 = vrot.slane %v1153_v43, %v2719_v38  ;;  %v1379_v52 = vrot.slane %v1208_v18, %v2648_v57 }
 0x235   : > { %v1128_v11 = vpop.xlane.xlu0 %1127 }
 0x236   : > { %v1151_v14 = vadd.f32 %v2629_v30, %v1128_v11 }
 0x237   : > { %v2701_v16 = vpop.xlane.xlu1 %1180 }
 0x238   : > { %v1304_v23 = vrot.slane %v1151_v14, %v2696_v13  ;;  %v1209_v22 = vadd.f32 %v2701_v16, %v2629_v30  ;;  %v1214_v16 = vadd.f32 %v2682_v4, %v2629_v30 }
 0x239   : > { %v1138_v20 = vpop.xlane.xlu0 %1137 }
 0x23a   : > { %v1306_v39 = vsel %vm1305_vm8, %v1304_v23, %v1299_v32  ;;  %v1156_v61 = vadd.f32 %v2629_v30, %v1138_v20  ;;  %v1384_v33 = vrot.slane %v1209_v22, %v2655_v51 }
 0x23b   : > { %v2713_v27 = vpop.xlane.xlu1 %1196  ;;  %v1313_v54 = vsel %vm1312_vm9, %v1311_v47, %v1306_v39  ;;  %v1216_v39 = vadd.f32 %v2651_v48, %v2629_v30 }
 0x23c   : > { %v1320_v26 = vsel %vm1319_vm10, %v1318_v58, %v1313_v54  ;;  %v1339_v7 = vrot.slane %v1156_v61, %v2738_v60  ;;  %v1217_v47 = vadd.f32 %v2713_v27, %v2629_v30 }
 0x23d   : > { %v1134_v41 = vpop.xlane.xlu0 %1133  ;;  %v1419_v54 = vrot.slane %v1216_v39, %v2710_v24 }
 0x23e   : > { %v1154_v45 = vadd.f32 %v2629_v30, %v1134_v41 }
 0x23f   : > { %v1177_v36 = vpop.xlane.xlu1 %1176 }
 0x240   : > { %v1325_v56 = vrot.slane %v1154_v45, %v2722_v34  ;;  %v1207_v14 = vadd.f32 %v1177_v36, %v2629_v30  ;;  %v1409_v36 = vrot.slane %v1214_v16, %v2690_v8 }
 0x241   : > { %v1136_v37 = vpop.xlane.xlu0 %1135 }
 0x242   : > { %v1155_v1 = vadd.f32 %v2629_v30, %v1136_v37  ;;  %v1327_v42 = vsel %vm1326_vm11, %v1325_v56, %v1320_v26  ;;  %v1374_v46 = vrot.slane %v1207_v14, %v2632_v49 }
 0x243   : > { %v1193_v62 = vpop.xlane.xlu1 %1192 }
 0x244   : > { %v1332_v63 = vrot.slane %v1155_v1, %v2730_v44  ;;  %v1375_v23 = vsel %vm1249_vm0, %v1374_v46, %v1370_v19  ;;  %v1215_v41 = vadd.f32 %v1193_v62, %v2629_v30 }
 0x245   : > { %v1140_v9 = vpop.xlane.xlu0 %1139  ;;  %v1380_v59 = vsel %vm1256_vm1, %v1379_v52, %v1375_v23 }
 0x246   : > { %v1334_v3 = vsel %vm1333_vm12, %v1332_v63, %v1327_v42  ;;  %v1157_v5 = vadd.f32 %v2629_v30, %v1140_v9  ;;  %v1385_v57 = vsel %vm1263_vm2, %v1384_v33, %v1380_v59  ;;  %v1414_v48 = vrot.slane %v1215_v41, %v2696_v13 }
 0x247   : > { %v1187_v10 = vpop.xlane.xlu1 %1186  ;;  %v1341_v17 = vsel %vm1340_vm13, %v1339_v7, %v1334_v3 }
 0x248   : > { %v1346_v11 = vrot.slane %v1157_v5, %v2744_v0  ;;  %v1212_v29 = vadd.f32 %v1187_v10, %v2629_v30 }
 0x24a   : > { %v1348_v28 = vsel %vm1347_vm14, %v1346_v11, %v1341_v17 }
 0x24b   : > { %v1183_v12 = vpop.xlane.xlu1 %1182  ;;  %1350 = vst [vmem:[%s2754_s24] sm:$0x1] %v1348_v28 }
 0x24c   : > { %v1210_v20 = vadd.f32 %v1183_v12, %v2629_v30 }
 0x24e   : > { %v1389_v49 = vrot.slane %v1210_v20, %v2658_v40  ;;  %v1399_v40 = vrot.slane %v1212_v29, %v2679_v2 }
 0x24f   : > { %v1199_v15 = vpop.xlane.xlu1 %1198 }
 0x250   : > { %v1390_v51 = vsel %vm1270_vm3, %v1389_v49, %v1385_v57  ;;  %v1218_v53 = vadd.f32 %v1199_v15, %v2629_v30 }
 0x252   : > { %v1429_v58 = vrot.slane %v1218_v53, %v2722_v34 }
 0x253   : > { %v1189_v21 = vpop.xlane.xlu1 %1188 }
 0x254   : > { %v1213_v35 = vadd.f32 %v1189_v21, %v2629_v30 }
 0x256   : > { %v1404_v50 = vrot.slane %v1213_v35, %v2686_v6  ;;  %v1424_v6 = vrot.slane %v1217_v47, %v2719_v38 }
 0x257   : > { %v1185_v31 = vpop.xlane.xlu1 %1184 }
 0x258   : > { %v1211_v32 = vadd.f32 %v1185_v31, %v2629_v30 }
 0x25a   : > { %v1394_v43 = vrot.slane %v1211_v32, %v2664_v55 }
 0x25b   : > { %v1203_v45 = vpop.xlane.xlu1 %1202 }
 0x25c   : > { %v1395_v4 = vsel %vm1277_vm4, %v1394_v43, %v1390_v51  ;;  %v1220_v1 = vadd.f32 %v1203_v45, %v2629_v30 }
 0x25d   : > { %v1400_v55 = vsel %vm1284_vm5, %v1399_v40, %v1395_v4 }
 0x25e   : > { %v1405_v2 = vsel %vm1291_vm6, %v1404_v50, %v1400_v55  ;;  %v1439_v34 = vrot.slane %v1220_v1, %v2738_v60 }
 0x25f   : > { %v1410_v27 = vsel %vm1298_vm7, %v1409_v36, %v1405_v2  ;;  %v1201_v56 = vpop.xlane.xlu1 %1200 }
 0x260   : > { %v1219_v37 = vadd.f32 %v1201_v56, %v2629_v30  ;;  %v1415_v8 = vsel %vm1305_vm8, %v1414_v48, %v1410_v27 }
 0x261   : > { %v1420_v13 = vsel %vm1312_vm9, %v1419_v54, %v1415_v8 }
 0x262   : > { %v1425_v24 = vsel %vm1319_vm10, %v1424_v6, %v1420_v13  ;;  %v1434_v61 = vrot.slane %v1219_v37, %v2730_v44 }
 0x263   : > { %v1430_v62 = vsel %vm1326_vm11, %v1429_v58, %v1425_v24  ;;  %v1205_v38 = vpop.xlane.xlu1 %1204 }
 0x264   : > { %v1435_v26 = vsel %vm1333_vm12, %v1434_v61, %v1430_v62  ;;  %v1221_v63 = vadd.f32 %v1205_v38, %v2629_v30 }
 0x265   : > { %v1440_v9 = vsel %vm1340_vm13, %v1439_v34, %v1435_v26 }
 0x266   : > { %v1444_v42 = vrot.slane %v1221_v63, %v2744_v0 }
 0x268   : > { %v1445_v44 = vsel %vm1347_vm14, %v1444_v42, %v1440_v9 }
 0x269   : > { %1447 = vst [vmem:[%s2754_s24 + $0x1] sm:$0x1] %v1445_v44 }
 0x26a   : > { %2092 = shalt.err (!%p2089_p5)
}
 0x26b   : > { %s2093_s20 = scalar_lea.hbm %s2814_s12, 32  ;;  %s2097_s3 = scalar_lea.hbm %s2861_s8, 64 }
 0x26c   : > { %p2094_p12 = scmp.ne.s32.totalorder %s2814_s12, %s2093_s20  ;;  %p2098_p3 = scmp.lt.s32.totalorder %s2814_s12, %s2861_s8 }
 0x26d   : > { %p2099_p4 = scmp.lt.s32.totalorder %s2097_s3, %s2093_s20 }
 0x26e   : > { %p2095_p0 = pnand %p2094_p12, %p2903_p13 }
 0x26f   : > { %p2100_p8 = por %p2099_p4, %p2098_p3 }
 0x270   : > { %p2096_p11 = pneg %p2095_p0 }
 0x272   : > { %p2101_p6 = pnand %p2100_p8, %p2096_p11 }
 0x274   : > { %2104 = shalt.err (!%p2101_p6)
}
 0x275   : > { %1838 = dma.vmem_to_hbm [thread:$0]  (%p2903_p13), %s1463_s25, 32, %s2814_s12, %s1449_s15  }
 0x276 PF: > { %s2904_s26 = sld [smem:[#allocation17_spill]]  ;;  %s1474_s23 = sand.u32 1, %s2139_s29  }
 0x277   : > { %p2905_p2 = scmp.ne.s32.totalorder %s2886_s19, 0  ;;  %s1475_s11 = scalar_lea.sflag [#allocation5], %s1474_s23 }
 0x27c   : > { %p2906_p7 = scmp.ge.s32.totalorder %s2904_s26, 2 }
 0x27e   : > { %p1858_p9 = pnand %p2906_p7, %p2905_p2 }
 0x280   : > { %p1859_p10 = pneg %p1858_p9 }
 0x282   : > { %2134 = dma.done.wait (%p1859_p10), %s1475_s11, 32  }
 0x283   : > { %2136 = vsyncadd (%p1859_p10), %s1475_s11, 4294967264  ;;  %s2907_s10 = sld [smem:[#allocation18_spill]]  ;;  %s2909_s29 = smov %s2143_s30 }
 0x284   : > { %s2908_s1 = sld [smem:[#allocation19_spill]]  ;;  %s2910_s30 = smov %s2147_s9 }
 0x289   : > { %p26_p1 = scmp.ge.s32.totalorder %s2907_s10, 4  }
 0x28a   : > { %s2911_s9 = smov %s2908_s1 }
 0x28b   :  { %28 = sbr.rel (!%p26_p1) target bundleno = 13 (0xd), region = 129 }
 0x290   :  { %1480 = vsyncpa [#allocation4], 1 }
 0x291   :  { %1482 = vsyncpa [#allocation4 + $0x1], 1 }
 0x292   :  { %1483 = vsyncpa [#allocation7], 1 }
 0x293   :  { %1485 = vsyncpa [#allocation7 + $0x1], 1 }
 0x294   :  { %1486 = vsyncpa [#allocation10], 1 }
 0x295   :  { %1487 = vsyncpa [#allocation5], 1 }
 0x296   :  { %1489 = vsyncpa [#allocation5 + $0x1], 1 }

</bundles_post_ra>
